<compile_context>
chip_gen: v5e
topology: v5e:2x2
jax: 0.10.0
libtpu: 0.0.40
codegen_flags: <defaults>
</compile_context>

<pallas_src>
import jax
import jax.numpy as jnp
import numpy as np
from jax.experimental import pallas as pl
from jax.experimental.pallas import tpu as pltpu

_LANE = 128   # lane width of a vreg
_SUB = 8      # sublane count of a vreg


def shadow_kernel(exp_ref, img_ref, out_ref):
    b = pl.program_id(0)

    e = exp_ref[b]                         # scalar exponent (1 - x[b]) from SMEM
    img = img_ref[...]                     # (1, row_tile, 128) lane-dense block

    # pow(v, e) for v > 0 via exp(e * log(v)); both transcendentals run on the
    # EUP so the VPU only sees a mul + clip per element.
    v = img + jnp.float32(1e-9)
    out = jnp.exp(e * jnp.log(v))
    out_ref[...] = jnp.clip(out, 0.0, 1.0).astype(out_ref.dtype)


def shadow_filter(image, x, *, row_tile=1024):
    """image: (N, C, H, W) float32; x: (N, 1, 1, 1) float32 per-image slider."""
    N, C, H, W = image.shape
    P = C * H * W

    # Per-image exponent, computed once in the wrapper (tiny XLA op).
    exp_flat = (1.0 - x.reshape(N)).astype(jnp.float32)

    # Flatten to a lane-dense slab: (N, rows_pad, 128), rows_pad % row tile == 0.
    rows = pl.cdiv(P, _LANE)
    rt = min(row_tile, ((rows + _SUB - 1) // _SUB) * _SUB)   # multiple of 8
    rows_pad = ((rows + rt - 1) // rt) * rt
    P_pad = rows_pad * _LANE

    img_flat = image.reshape(N, P)
    if P_pad != P:
        img_flat = jnp.pad(img_flat, ((0, 0), (0, P_pad - P)))
    img3 = img_flat.reshape(N, rows_pad, _LANE)

    grid = (N, rows_pad // rt)

    out3 = pl.pallas_call(
        shadow_kernel,
        out_shape=jax.ShapeDtypeStruct((N, rows_pad, _LANE), image.dtype),
        grid=grid,
        in_specs=[
            pl.BlockSpec(memory_space=pltpu.MemorySpace.SMEM),          # exp (N,)
            pl.BlockSpec((1, rt, _LANE), lambda b, r: (b, r, 0)),       # image tile
        ],
        out_specs=pl.BlockSpec((1, rt, _LANE), lambda b, r: (b, r, 0)),
        compiler_params=pltpu.CompilerParams(
            dimension_semantics=("parallel", "parallel")),
    )(exp_flat, img3)

    return out3.reshape(N, P_pad)[:, :P].reshape(N, C, H, W)


def shadow_filter_ref(image, x):
    """Pure-JAX reference mirroring the PyTorch module."""
    e = -x + 1.0
    out = jnp.clip(jnp.power(image + 1e-9, e), 0.0, 1.0)
    return jnp.clip(out, 0.0, 1.0)


if __name__ == "__main__":
    key = jax.random.PRNGKey(0)
    k_img, k_x = jax.random.split(key)

    N, C, H, W = 2, 4, 16, 16
    image = jax.random.uniform(k_img, (N, C, H, W), dtype=jnp.float32)
    # per-image shadow slider in (-1, 1), shape (N,1,1,1) as the module expects
    x = jax.random.uniform(k_x, (N, 1, 1, 1), dtype=jnp.float32,
                           minval=-1.0, maxval=1.0)

    out = shadow_filter(image, x)
    out = jax.block_until_ready(out)

    ref = shadow_filter_ref(image, x)
    assert out.shape == image.shape and out.dtype == image.dtype
    np.testing.assert_allclose(np.asarray(out), np.asarray(ref),
                               rtol=1e-5, atol=1e-5)

    print("KERNEL_OK")
</pallas_src>

<mosaic_0001>
module attributes {stable_mosaic.version = 11 : i64} {
  func.func @shadow_kernel(%arg0: i32, %arg1: i32, %arg2: memref<2xf32, #tpu.memory_space<smem>>, %arg3: memref<1x8x128xf32, #tpu.memory_space<vmem>>, %arg4: memref<1x8x128xf32, #tpu.memory_space<vmem>>) attributes {dimension_semantics = [#tpu.dimension_semantics<parallel>, #tpu.dimension_semantics<parallel>], iteration_bounds = array<i64: 2, 1>, scalar_prefetch = 0 : i64, scratch_operands = 0 : i64, tpu.core_type = #tpu.core_type<tc>, window_params = [{transform_indices = @transform_0, window_bounds = array<i64: 2>}, {transform_indices = @transform_1, window_bounds = array<i64: 1, 8, 128>}, {transform_indices = @transform_2, window_bounds = array<i64: 1, 8, 128>}]} {
    %0 = arith.index_cast %arg0 : i32 to index
    %1 = memref.load %arg2[%0] : memref<2xf32, #tpu.memory_space<smem>>
    %c0 = arith.constant 0 : index
    %c0_0 = arith.constant 0 : index
    %c0_1 = arith.constant 0 : index
    %2 = vector.load %arg3[%c0, %c0_0, %c0_1] : memref<1x8x128xf32, #tpu.memory_space<vmem>>, vector<1x8x128xf32>
    %cst = arith.constant 9.99999971E-10 : f32
    %3 = vector.broadcast %cst : f32 to vector<1x8x128xf32>
    %4 = arith.addf %2, %3 : vector<1x8x128xf32>
    %5 = math.log %4 : vector<1x8x128xf32>
    %6 = vector.broadcast %1 : f32 to vector<1x8x128xf32>
    %7 = arith.mulf %6, %5 : vector<1x8x128xf32>
    %8 = math.exp %7 : vector<1x8x128xf32>
    %cst_2 = arith.constant 0.000000e+00 : f32
    %cst_3 = arith.constant 1.000000e+00 : f32
    %9 = vector.broadcast %cst_2 : f32 to vector<1x8x128xf32>
    %10 = arith.maximumf %9, %8 : vector<1x8x128xf32>
    %11 = vector.broadcast %cst_3 : f32 to vector<1x8x128xf32>
    %12 = arith.minimumf %11, %10 : vector<1x8x128xf32>
    %c0_4 = arith.constant 0 : index
    %c0_5 = arith.constant 0 : index
    %c0_6 = arith.constant 0 : index
    %13 = vector.load %arg4[%c0_4, %c0_5, %c0_6] : memref<1x8x128xf32, #tpu.memory_space<vmem>>, vector<1x8x128xf32>
    tpu.vector_store %arg4[%c0_4, %c0_5, %c0_6], %12 {strides = array<i32>} : memref<1x8x128xf32, #tpu.memory_space<vmem>>, vector<1x8x128xf32>,
    return
  }
  func.func @transform_0(%arg0: i32, %arg1: i32) -> i32 {
    %c0_i32 = arith.constant 0 : i32
    %c0_i32_0 = arith.constant 0 : i32
    return %c0_i32 : i32
  }
  func.func @transform_1(%arg0: i32, %arg1: i32) -> (i32, i32, i32) {
    %c0_i32 = arith.constant 0 : i32
    %c0_i32_0 = arith.constant 0 : i32
    return %arg0, %arg1, %c0_i32 : i32, i32, i32
  }
  func.func @transform_2(%arg0: i32, %arg1: i32) -> (i32, i32, i32) {
    %c0_i32 = arith.constant 0 : i32
    %c0_i32_0 = arith.constant 0 : i32
    return %arg0, %arg1, %c0_i32 : i32, i32, i32
  }
}

</mosaic_0001>

<bundles_post_ra>
// kernel: tpu_custom_call.1
= control target key start
LH: loop header
LB: loop body
LE: loop exit
PB: predicated region body
PF: predicated region fallthrough
CT: control target
= control target key end

     0   :  { %7 = vsyncpa [#allocation5], 0  ;;  %s700_s0 = inlined_call_operand.hbm [shape: f32[2], index: 0, kind: input, shape index: {}]   ;;  %s701_s1 = inlined_call_operand.hbm [shape: f32[2,8,128], index: 1, kind: input, shape index: {}]   ;;  %s702_s2 = inlined_call_operand.hbm [shape: f32[2,8,128], index: 2, kind: output, shape index: {}]  }
   0x1   :  { %8 = vsyncpa [#allocation3], 0 }
   0x2   :  { %10 = vsyncpa [#allocation3 + $0x1], 0 }
   0x3   :  { %11 = vsyncpa [#allocation4], 0 }
   0x4   :  { %13 = vsyncpa [#allocation4 + $0x1], 0  ;;  %s554_s9 = smov 0   ;;  %s556_s10 = smov 0  }
   0x5   :  { %s558_s11 = smov 0   ;;  %s560_s12 = smov 0  }
   0x6   :  { %s562_s13 = smov 0   ;;  %s564_s14 = smov 0  }
   0x7 LB: > { %s313_s15 = sadd.s32 4294967295, %s536_s14   ;;  %s314_s16 = sadd.s32 4294967294, %s536_s14   ;;  %s536_s14 = sphi %s564_s14, %s19_s14   ;;  %s532_s13 = sphi %s562_s13, %s714_s13   ;;  %s528_s12 = sphi %s560_s12, %s713_s12   ;;  %s524_s11 = sphi %s558_s11, %s712_s11   ;;  %s520_s10 = sphi %s556_s10, %s711_s10   ;;  %s516_s9 = sphi %s554_s9, %s710_s9  }
   0x8   : > { %p74_p0 = scmp.ne.s32.totalorder %s520_s10, %s516_s9  ;;  %p588_p1 = scmp.eq.s32.totalorder %s313_s15, 0 }
   0x9   : > { %p592_p2 = scmp.eq.s32.totalorder %s313_s15, 1  ;;  %p106_p3 = scmp.eq.s32.totalorder %s314_s16, 1 }
   0xa   : > { %p598_p4 = por %p588_p1, %p74_p0  ;;  %p315_p5 = scmp.ge.s32.totalorder %s536_s14, 1 }
   0xb   : > { %p603_p6 = por %p106_p3, %p74_p0  ;;  %p113_p7 = scmp.lt.s32.totalorder %s536_s14, 3 }
   0xc   : > { %s125_s23 = sshll.u32 %s700_s0, 4  ;;  %s31_s25 = sadd.s32 1, %s532_s13  ;;  %s126_s23 = int_to_ptr.hbm [resolvable:$true] %s125_s23 }
   0xd   : > { %p611_p8 = pnand %p315_p5, %p113_p7  ;;  %s61_s26 = sadd.s32 1, %s524_s11 }
   0xe   : > { %p33_p12 = scmp.ge.s32.totalorder %s31_s25, 2  ;;  %s538_s27 = smov [#allocation2]  }
   0xf   : > { %p336_p10 = pneg %p611_p8  ;;  %p68_p13 = scmp.ne.s32.totalorder %s524_s11, %s520_s10 }
  0x10   : > { %s716_s25 = smov (%p33_p12, %s31_s25), 0  ;;  %p69_p0 = scmp.eq.s32.totalorder %s536_s14, 0 }
  0x11   : > { %p337_p11 = pnand %p336_p10, %p588_p1  ;;  %s56_s28 = ssub.s32 %s532_s13, %s716_s25 }
  0x12   : > { %p349_p3 = scmp.lt.s32.totalorder %s536_s14, 2  ;;  %p59_p5 = scmp.eq.s32.totalorder %s56_s28, 0 }
  0x13   : > { %339 = dma.hbm_to_smem (!%p337_p11), %s126_s23, 16, %s538_s27, [#allocation5]  }
  0x14   : > { %p70_p7 = por %p69_p0, %p68_p13  ;;  %p632_p9 = por %p592_p2, %p68_p13 }
  0x15   : > { %s136_s30 = sand.u32 1, %s524_s11   ;;  %s319_s5 = sshll.u32 %s532_s13, 3 }
  0x16   : > { %s638_s3 = scalar_select %p59_p5, %s524_s11, %s61_s26  }
  0x17   : > { %s318_s4 = sshll.u32 %s136_s30, 3  ;;  %s145_s8 = scalar_lea.hbm %s701_s1, %s319_s5 }
  0x18   : > { %s140_s15 = scalar_lea.vmem [#allocation6], %s318_s4  ;;  %s147_s21 = sshll.u32 %s145_s8, 4  ;;  %s148_s21 = int_to_ptr.hbm [resolvable:$true] %s147_s21 }
  0x19   : > { %s149_s16 = sshll.u32 %s140_s15, 4  ;;  %p341_p10 = pnand %p349_p3, %p70_p7  ;;  %s150_s16 = int_to_ptr.vmem [resolvable:$true] %s149_s16 }
  0x1a   : > { %s137_s18 = scalar_lea.sflag [#allocation3], %s136_s30  ;;  %158 = sbr.rel (%p611_p8) target bundleno = 68 (0x44), region = 28 }
  0x1b   : > { %343 = dma.hbm_to_vmem [thread:$0]  (!%p341_p10), %s148_s21, 128, %s150_s16, %s137_s18  }
  0x1f   : > { %503 = dma.done.wait (%p588_p1), [#allocation5], 16  }
  0x20   : > { %505 = vsyncadd (%p588_p1), [#allocation5], 4294967280  ;;  %s653_s22 = sand.u32 1, %s520_s10  }
  0x21   : > { %s322_s23 = sshll.u32 %s653_s22, 3  ;;  %s166_s26 = scalar_lea.sflag [#allocation3], %s653_s22 }
  0x22   : > { %s169_s27 = scalar_lea.vmem [#allocation6], %s322_s23 }
  0x23   : > { %507 = dma.done.wait (%p598_p4), %s166_s26, 128  }
  0x24   : > { %509 = vsyncadd (%p598_p4), %s166_s26, 4294967168 }
  0x25   : > { %175 = sfence }
  0x26   : > { %v193_v0 = vld [vmem:[%s169_s27] sm:$0xff]  ;;  %s192_s17 = sld [smem:[#allocation2 + %s528_s12]]  ;;  %s325_s24 = sshll.u32 %s528_s12, 3 }
  0x27   : > { %v194_v1 = vadd.f32 1e-09, %v193_v0  ;;  %s216_s19 = scalar_lea.hbm %s702_s2, %s325_s24  ;;  %s191_s4 = scalar_lea.vmem [#allocation7], %s322_s23 }
  0x28   : > { %s218_s5 = sshll.u32 %s191_s4, 4  ;;  %s220_s6 = sshll.u32 %s216_s19, 4  ;;  %s219_s5 = int_to_ptr.vmem [resolvable:$true] %s218_s5  ;;  %s221_s6 = int_to_ptr.hbm [resolvable:$true] %s220_s6 }
  0x29   : > { %401 = vlog2.f32 %v194_v1  ;;  %s205_s7 = scalar_lea.sflag [#allocation4], %s653_s22  ;;  %s464_s8 = sshra.s32 %s221_s6, 4  ;;  %s465_s8 = int_to_ptr.hbm [resolvable:$true] %s464_s8 }
  0x2a   : > { %s466_s15 = scalar_lea.hbm %s465_s8, 8  ;;  %s470_s21 = scalar_lea.hbm %s702_s2, 16 }
  0x2b   : > { %p467_p1 = scmp.ne.s32.totalorder %s465_s8, %s466_s15  ;;  %p471_p8 = scmp.lt.s32.totalorder %s465_s8, %s702_s2 }
  0x2c   : > { %v197_v3 = vstv %s192_s17  ;;  %p472_p11 = scmp.lt.s32.totalorder %s470_s21, %s466_s15 }
  0x2d   : > { %p468_p2 = pnand %p467_p1, %p632_p9 }
  0x2e   : > { %p473_p12 = por %p472_p11, %p471_p8 }
  0x2f   : > { %v402_v2 = vpop.eup %401  ;;  %p469_p4 = pneg %p468_p2 }
  0x30   : > { %v196_v4 = vmul.f32 0.6931472, %v402_v2 }
  0x31   : > { %p474_p13 = pnand %p473_p12, %p469_p4 }
  0x32   : > { %v198_v5 = vmul.f32 %v197_v3, %v196_v4 }
  0x34   : > { %v199_v6 = vmul.f32 1.442695, %v198_v5 }
  0x36   : > { %403 = vpow2.f32 %v199_v6 }
  0x3c   : > { %v404_v7 = vpop.eup %403 }
  0x3d   : > { %v201_v8 = vmax.f32 %v404_v7, 0.0 }
  0x3f   : > { %v202_v9 = vmin.f32 %v201_v8, 1.0 }
  0x41   : > { %203 = vst [vmem:[%s191_s4] sm:$0xff] %v202_v9 }
  0x42   : > { %477 = shalt.err (!%p474_p13)
}
  0x43   : > { %334 = dma.vmem_to_hbm [thread:$0]  (%p632_p9), %s219_s5, 128, %s221_s6, %s205_s7  }
  0x44 PF: > { %s232_s22 = sand.u32 1, %s516_s9   ;;  %p709_p0 = scmp.ge.s32.totalorder %s536_s14, 2 }
  0x45   : > { %s233_s26 = scalar_lea.sflag [#allocation4], %s232_s22 }
  0x46   : > { %p345_p3 = pnand %p709_p0, %p603_p6 }
  0x48   : > { %p346_p5 = pneg %p345_p3 }
  0x4a   : > { %511 = dma.done.wait (%p346_p5), %s233_s26, 128  }
  0x4b   : > { %513 = vsyncadd (%p346_p5), %s233_s26, 4294967168  ;;  %s19_s14 = sadd.s32 1, %s536_s14   ;;  %s710_s9 = smov %s520_s10 }
  0x4c   : > { %p16_p7 = scmp.ge.s32.totalorder %s19_s14, 4   ;;  %s711_s10 = smov %s524_s11 }
  0x4d   : > { %s712_s11 = smov %s638_s3  ;;  %s713_s12 = smov %s532_s13 }
  0x4e   : > { %s714_s13 = smov %s716_s25  ;;  %18 = sbr.rel (!%p16_p7) target bundleno = 7 (0x7), region = 78 }
  0x53   :  { %239 = vsyncpa [#allocation3], 1 }
  0x54   :  { %241 = vsyncpa [#allocation3 + $0x1], 1 }
  0x55   :  { %242 = vsyncpa [#allocation4], 1 }
  0x56   :  { %244 = vsyncpa [#allocation4 + $0x1], 1 }
  0x57   :  { %245 = vsyncpa [#allocation5], 1 }
  0x58   :  { %247 = vsyncpa [#allocation5 + $0x1], 1 }

</bundles_post_ra>
